<compile_context>
chip_gen: v6e
topology: v6e:2x2x1
jax: 0.10.0
libtpu: 0.0.40
codegen_flags: <defaults>
</compile_context>

<pallas_src>
import math

import jax
import jax.numpy as jnp
from jax import lax
from jax.experimental import pallas as pl
from jax.experimental.pallas import tpu as pltpu


def _round_up(x, m):
    return ((x + m - 1) // m) * m


def _prefer_batch_grid():
    """True on multi-TensorCore chips (v7x): shard the batch grid across TCs."""
    try:
        kind = jax.devices()[0].device_kind.lower()
    except Exception:
        return False
    return ("v7" in kind) or ("tpu7" in kind) or ("tpu 7" in kind)


# ----------------------------- Pallas kernels -------------------------------


def _conv_kernel_batch(col_ref, w_ref, o_ref):
    # col_ref: (1, D_pad, HW) bf16 pre-built im2col for one batch element
    # w_ref:   (Cout, D_pad)  bf16 folded weights (+ bias column)
    # o_ref:   (1, Cout, HW)  f32 lane-dense output tile
    o_ref[0] = jnp.dot(
        w_ref[...], col_ref[0], preferred_element_type=jnp.float32
    )


def _conv_kernel_fused(col_ref, w_ref, o_ref):
    # col_ref: (D_pad, N*HW) bf16 im2col with N folded into the lane dim
    # w_ref:   (Cout, D_pad) bf16
    # o_ref:   (Cout, N*HW)  f32
    o_ref[...] = jnp.dot(
        w_ref[...], col_ref[...], preferred_element_type=jnp.float32
    )


# ------------------------------ host wrapper --------------------------------


def _fused_conv_pallas(x_nchw, w_fold, *, H, W, K, D, D_pad):
    """x_nchw: (N,Cin,H,W) f32; w_fold: (Cout, D_pad) bf16 (bias in col D)."""
    N, Cin = x_nchw.shape[0], x_nchw.shape[1]
    Cout = w_fold.shape[0]
    HW = H * W
    P = (K - 1) // 2

    # Wrapper-side im2col: pad once, take K*K statically shifted views.  Taps
    # are ordered (kh, kw, ci) to match the w_fold column ordering.  Done in
    # bf16 so the extra HBM traffic is ~0.5 MB/batch at these shapes.
    x_bf = x_nchw.astype(jnp.bfloat16)
    xp = jnp.pad(x_bf, ((0, 0), (0, 0), (P, P), (P, P)))
    taps = jnp.stack(
        [xp[:, :, kh:kh + H, kw:kw + W] for kh in range(K) for kw in range(K)],
        axis=0,
    )  # (K*K, N, Cin, H, W)

    use_batch_grid = _prefer_batch_grid() and N > 1

    if use_batch_grid:
        # v7x: grid=(N,) marked "parallel" -> one batch element per TensorCore.
        col = jnp.transpose(taps, (1, 0, 2, 3, 4)).reshape(N, D, HW)
        col = jnp.concatenate(
            [
                col,
                jnp.ones((N, 1, HW), jnp.bfloat16),          # bias carrier row
                jnp.zeros((N, D_pad - D - 1, HW), jnp.bfloat16),
            ],
            axis=1,
        )  # (N, D_pad, HW)

        out = pl.pallas_call(
            _conv_kernel_batch,
            out_shape=jax.ShapeDtypeStruct((N, Cout, HW), jnp.float32),
            grid_spec=pltpu.PrefetchScalarGridSpec(
                num_scalar_prefetch=0,
                grid=(N,),
                in_specs=[
                    pl.BlockSpec((1, D_pad, HW), lambda n: (n, 0, 0)),
                    pl.BlockSpec((Cout, D_pad), lambda n: (0, 0)),
                ],
                out_specs=pl.BlockSpec((1, Cout, HW), lambda n: (n, 0, 0)),
            ),
            compiler_params=pltpu.CompilerParams(
                dimension_semantics=("parallel",),
            ),
        )(col, w_fold)
        return out.reshape(N, Cout, H, W)  # free reshape -> NCHW

    # v5e / v6e (single TensorCore): fold N into the lane dim -> ONE grid
    # step, one (Cout, D_pad) x (D_pad, N*HW) matmul.
    col = jnp.transpose(taps, (0, 2, 1, 3, 4)).reshape(D, N * HW)
    col = jnp.concatenate(
        [
            col,
            jnp.ones((1, N * HW), jnp.bfloat16),              # bias carrier row
            jnp.zeros((D_pad - D - 1, N * HW), jnp.bfloat16),
        ],
        axis=0,
    )  # (D_pad, N*HW)

    out = pl.pallas_call(
        _conv_kernel_fused,
        out_shape=jax.ShapeDtypeStruct((Cout, N * HW), jnp.float32),
    )(col, w_fold)
    # (Cout, N*HW) -> (N, Cout, H, W); tiny (16 KB) wrapper-side transpose.
    return jnp.transpose(out.reshape(Cout, N, H, W), (1, 0, 2, 3))


# -------------------------- module-level wrapper ----------------------------


def init_inception_params(key, in_channels, out_channels, num_kernels):
    """Deterministic kaiming_normal(mode='fan_out', relu) init, zero bias."""
    weights, biases = [], []
    for i in range(num_kernels):
        k = 2 * i + 1
        key, sub = jax.random.split(key)
        fan_out = out_channels * k * k
        std = math.sqrt(2.0 / fan_out)
        w = std * jax.random.normal(
            sub, (out_channels, in_channels, k, k), dtype=jnp.float32
        )  # OIHW (PyTorch layout)
        weights.append(w)
        biases.append(jnp.zeros((out_channels,), jnp.float32))
    return weights, biases


def inception_block_v1(x_nchw, weights, biases):
    """Forward pass equivalent to Inception_Block_V1.forward (NCHW in/out)."""
    num_kernels = len(weights)
    Cout, Cin = weights[0].shape[0], weights[0].shape[1]
    K = 2 * (num_kernels - 1) + 1  # largest kernel size
    N, _, H, W = x_nchw.shape

    # Fold the num_kernels convolutions into one equivalent conv (exact):
    # mean_i conv_{k_i,pad=i}(x; W_i,b_i)
    #   == conv_{K,pad=P}(x; mean_i pad(W_i), mean_i b_i)
    w_sum = jnp.zeros((Cout, Cin, K, K), jnp.float32)
    for i, w in enumerate(weights):
        k = 2 * i + 1
        d = (K - k) // 2
        w_sum = w_sum + jnp.pad(
            w.astype(jnp.float32), ((0, 0), (0, 0), (d, d), (d, d))
        )
    w_avg = w_sum / num_kernels
    b_avg = (sum(biases) / num_kernels).astype(jnp.float32)

    D = K * K * Cin                  # 484 at these shapes
    D_pad = _round_up(D + 1, 128)    # 512: sublane-pack + MXU-depth aligned

    # (Cout,Cin,kh,kw) -> (Cout, kh*K*Cin + kw*Cin + ci) to match the im2col
    # row ordering; bias goes in column D (paired with the ones row).
    w_flat = jnp.transpose(w_avg, (0, 2, 3, 1)).reshape(Cout, D)
    w_fold = jnp.concatenate(
        [w_flat, b_avg[:, None], jnp.zeros((Cout, D_pad - D - 1), jnp.float32)],
        axis=1,
    ).astype(jnp.bfloat16)

    return _fused_conv_pallas(x_nchw, w_fold, H=H, W=W, K=K, D=D, D_pad=D_pad)


# --------------------------------- main -------------------------------------


if __name__ == "__main__":
    N, Cin, Cout, H, W = 2, 4, 8, 16, 16
    num_kernels = 6

    key = jax.random.PRNGKey(0)
    key, xkey, bkey = jax.random.split(key, 3)
    x = jax.random.normal(xkey, (N, Cin, H, W), dtype=jnp.float32)

    weights, biases = init_inception_params(key, Cin, Cout, num_kernels)
    # PyTorch's init zeroes the biases; use small nonzero biases here so the
    # bias-via-matmul fold is actually exercised (forward handles any bias).
    bkeys = jax.random.split(bkey, num_kernels)
    biases = [
        0.05 * jax.random.normal(bk, (Cout,), dtype=jnp.float32) for bk in bkeys
    ]

    out = inception_block_v1(x, weights, biases)
    out = jax.block_until_ready(out)

    # Pure-JAX f32 reference: per-branch convs averaged, same as the PyTorch
    # forward.  Tolerance accounts for the bf16 activation/weight path
    # (f32 accumulation keeps the error ~1e-3 at these shapes).
    ref = jnp.zeros((N, Cout, H, W), jnp.float32)
    for i in range(num_kernels):
        r = lax.conv_general_dilated(
            x,
            weights[i],
            window_strides=(1, 1),
            padding=[(i, i), (i, i)],
            dimension_numbers=("NCHW", "OIHW", "NCHW"),
        ) + biases[i][None, :, None, None]
        ref = ref + r
    ref = ref / num_kernels

    assert out.shape == (N, Cout, H, W)
    if not jnp.allclose(out, ref, rtol=2e-2, atol=2e-2):
        raise AssertionError("Pallas conv does not match reference")

    print("KERNEL_OK")
</pallas_src>

<mosaic_0001>
module attributes {stable_mosaic.version = 11 : i64} {
  func.func @_conv_kernel_fused(%arg0: memref<512x512xbf16, #tpu.memory_space<vmem>>, %arg1: memref<8x512xbf16, #tpu.memory_space<vmem>>, %arg2: memref<8x512xf32, #tpu.memory_space<vmem>>) attributes {dimension_semantics = [], scalar_prefetch = 0 : i64, scratch_operands = 0 : i64, tpu.core_type = #tpu.core_type<tc>} {
    %c0 = arith.constant 0 : index
    %c0_0 = arith.constant 0 : index
    %0 = vector.load %arg1[%c0, %c0_0] : memref<8x512xbf16, #tpu.memory_space<vmem>>, vector<8x512xbf16>
    %c0_1 = arith.constant 0 : index
    %c0_2 = arith.constant 0 : index
    %1 = vector.load %arg0[%c0_1, %c0_2] : memref<512x512xbf16, #tpu.memory_space<vmem>>, vector<512x512xbf16>
    %cst = arith.constant dense<0.000000e+00> : vector<8x512xf32>
    %2 = tpu.matmul %0, %1, %cst {dimension_numbers = #tpu.dot_dimension_numbers<[1], [0], [0], [1], [0, 0, 1, 1], [], []>} : vector<8x512xbf16>, vector<512x512xbf16>, vector<8x512xf32> -> vector<8x512xf32>
    %c0_3 = arith.constant 0 : index
    %c0_4 = arith.constant 0 : index
    %3 = vector.load %arg2[%c0_3, %c0_4] : memref<8x512xf32, #tpu.memory_space<vmem>>, vector<8x512xf32>
    tpu.vector_store %arg2[%c0_3, %c0_4], %2 {strides = array<i32>} : memref<8x512xf32, #tpu.memory_space<vmem>>, vector<8x512xf32>,
    return
  }
}

</mosaic_0001>

<bundles_post_ra>
// kernel: tpu_custom_call.1
= control target key start
LH: loop header
LB: loop body
LE: loop exit
PB: predicated region body
PF: predicated region fallthrough
CT: control target
= control target key end

     0   :  { %7 = vsyncpa [#allocation3], 0  ;;  %s1446_s0 = inlined_call_operand.hbm [shape: bf16[512,512], index: 0, kind: input, shape index: {}]   ;;  %s1447_s1 = inlined_call_operand.hbm [shape: bf16[8,512], index: 1, kind: input, shape index: {}]   ;;  %s1448_s2 = inlined_call_operand.hbm [shape: f32[8,512], index: 2, kind: output, shape index: {}]  }
   0x1   :  { %8 = vsyncpa [#allocation6], 0 }
   0x2   :  { %9 = vsyncpa [#allocation4], 0  ;;  %s1405_s9 = smov [#allocation2]  }
   0x3   :  { %s15_s10 = sshll.u32 %s1405_s9, 4  ;;  %s16_s10 = int_to_ptr.vmem [resolvable:$true] %s15_s10 }
   0x4   :  { %s1347_s11 = scalar_lea.vmem %s16_s10, 16384  ;;  %p1352_p1 = scmp.lt.s32.totalorder %s16_s10, %s16_s10 }
   0x5   :  { %p1348_p0 = scmp.ne.s32.totalorder %s16_s10, %s1347_s11  ;;  %p1353_p2 = scmp.lt.s32.totalorder %s1347_s11, %s1347_s11 }
   0x7   :  { %p1354_p3 = por %p1353_p2, %p1352_p1 }
   0x9   :  { %p1355_p4 = pnand %p1354_p3, %p1348_p0 }
   0xb   :  { %1358 = shalt.err (!%p1355_p4)
}
   0xc   :  { %s1406_s12 = smov 256   ;;  %s1407_s13 = smov 16  }
   0xd   :  { %21 = dma.hbm_to_vmem [thread:$0]  %s1446_s0, 16384, %s16_s10, [#allocation3], %s1406_s12, %s1406_s12, %s1407_s13  }
   0xe   :  { %s1408_s16 = smov [#allocation5]  }
   0xf   :  { %s28_s17 = sshll.u32 %s1408_s16, 4  ;;  %s29_s17 = int_to_ptr.vmem [resolvable:$true] %s28_s17 }
  0x10   :  { %s1367_s18 = scalar_lea.vmem %s29_s17, 256  ;;  %p1372_p6 = scmp.lt.s32.totalorder %s29_s17, %s29_s17 }
  0x11   :  { %p1368_p5 = scmp.ne.s32.totalorder %s29_s17, %s1367_s18  ;;  %p1373_p7 = scmp.lt.s32.totalorder %s1367_s18, %s1367_s18 }
  0x13   :  { %p1374_p8 = por %p1373_p7, %p1372_p6 }
  0x15   :  { %p1375_p9 = pnand %p1374_p8, %p1368_p5 }
  0x17   :  { %1378 = shalt.err (!%p1375_p9)
}
  0x18   :  { %31 = dma.hbm_to_vmem [thread:$0]  %s1447_s1, 256, %s29_s17, [#allocation6]  }
  0x19   :  { %1399 = dma.done.wait [#allocation3], 16384  }
  0x1a   :  { %1400 = vsyncadd [#allocation3], 4294950912 }
  0x1b   :  { %1401 = dma.done.wait [#allocation6], 256  }
  0x1c   :  { %1402 = vsyncadd [#allocation6], 4294967040  ;;  %v1143_v0 = vld [vmem:[#allocation2 + $0xe4] ss:$16 sps:$4 sm:$0xff]   ;;  %v1147_v2 = vld [vmem:[#allocation2 + $0xe0] ss:$16 sps:$4 sm:$0xff]  }
  0x1d   :  { %v1145_v1 = vld [vmem:[#allocation2 + $0x2e4] ss:$16 sps:$4 sm:$0xff]   ;;  %822 = vmatprep.subr.bf16.mxu0 %v1143_v0  ;;  %v1148_v3 = vld [vmem:[#allocation2 + $0x2e0] ss:$16 sps:$4 sm:$0xff]   ;;  %v39_v48 = vld [vmem:[#allocation5 + $0x8] sm:$0xff]  ;;  %s1409_s0 = smov [#allocation7]  }
  0x1e   :  { %863 = vmatprep.subr.bf16.mxu1 %v1145_v1  ;;  %v1149_v4 = vld [vmem:[#allocation2 + $0xc4] ss:$16 sps:$4 sm:$0xff]   ;;  %823 = vmatpush1.bf16.msra.mxu0 %v1147_v2  ;;  %v1153_v6 = vld [vmem:[#allocation2 + $0xc0] ss:$16 sps:$4 sm:$0xff]   ;;  %v1009_v51 = vcombine.high %v39_v48, %v39_v48  ;;  %s996_s1 = sshll.u32 %s1409_s0, 4  ;;  %s997_s1 = int_to_ptr.vmem [resolvable:$true] %s996_s1 }
  0x1f   :  { %864 = vmatpush1.bf16.msra.mxu1 %v1148_v3  ;;  %v1151_v5 = vld [vmem:[#allocation2 + $0x2c4] ss:$16 sps:$4 sm:$0xff]   ;;  %824 = vmatprep.subr.bf16.mxu0 %v1149_v4  ;;  %v1154_v7 = vld [vmem:[#allocation2 + $0x2c0] ss:$16 sps:$4 sm:$0xff]   ;;  %v1245_v4 = vld [vmem:[#allocation2 + $0xec] ss:$16 sps:$4 sm:$0xff]   ;;  %p1384_p11 = scmp.lt.s32.totalorder %s997_s1, %s997_s1 }
  0x20   :  { %865 = vmatprep.subr.bf16.mxu1 %v1151_v5  ;;  %v1155_v8 = vld [vmem:[#allocation2 + $0xa4] ss:$16 sps:$4 sm:$0xff]   ;;  %v1159_v10 = vld [vmem:[#allocation2 + $0xa0] ss:$16 sps:$4 sm:$0xff]   ;;  %895 = vmatprep.mubr.bf16.mxu1 %v1009_v51  ;;  %v1248_v5 = vld [vmem:[#allocation2 + $0x2ec] ss:$16 sps:$4 sm:$0xff]  }
  0x21   :  { %v1157_v9 = vld [vmem:[#allocation2 + $0x2a4] ss:$16 sps:$4 sm:$0xff]   ;;  %v1160_v11 = vld [vmem:[#allocation2 + $0x2a0] ss:$16 sps:$4 sm:$0xff]   ;;  %s1379_s21 = scalar_lea.vmem %s997_s1, 512 }
  0x22   :  { %825 = vmatpush1.bf16.msra.mxu0 %v1153_v6  ;;  %v1161_v12 = vld [vmem:[#allocation2 + $0x84] ss:$16 sps:$4 sm:$0xff]   ;;  %v1165_v14 = vld [vmem:[#allocation2 + $0x80] ss:$16 sps:$4 sm:$0xff]   ;;  %p1380_p10 = scmp.ne.s32.totalorder %s997_s1, %s1379_s21  ;;  %p1385_p12 = scmp.lt.s32.totalorder %s1379_s21, %s1379_s21 }
  0x23   :  { %866 = vmatpush1.bf16.msra.mxu1 %v1154_v7  ;;  %826 = vmatprep.subr.bf16.mxu0 %v1155_v8  ;;  %v1163_v13 = vld [vmem:[#allocation2 + $0x284] ss:$16 sps:$4 sm:$0xff]   ;;  %v1166_v15 = vld [vmem:[#allocation2 + $0x280] ss:$16 sps:$4 sm:$0xff]   ;;  %v1436_v7 = vcombine.low %v39_v48, %v39_v48  ;;  %v1243_v8 = vld [vmem:[#allocation2 + $0xe8] ss:$16 sps:$4 sm:$0xff]  }
  0x24   :  { %867 = vmatprep.subr.bf16.mxu1 %v1157_v9  ;;  %v1167_v16 = vld [vmem:[#allocation2 + $0x64] ss:$16 sps:$4 sm:$0xff]   ;;  %v1171_v18 = vld [vmem:[#allocation2 + $0x60] ss:$16 sps:$4 sm:$0xff]   ;;  %v1246_v9 = vld [vmem:[#allocation2 + $0x2e8] ss:$16 sps:$4 sm:$0xff]   ;;  %p1386_p13 = por %p1385_p12, %p1384_p11 }
  0x25   :  { %v1169_v17 = vld [vmem:[#allocation2 + $0x264] ss:$16 sps:$4 sm:$0xff]   ;;  %v1172_v19 = vld [vmem:[#allocation2 + $0x260] ss:$16 sps:$4 sm:$0xff]   ;;  %v1303_v48 = vld [vmem:[#allocation2 + $0x1a8] ss:$16 sps:$4 sm:$0xff]  }
  0x26   :  { %827 = vmatpush1.bf16.msra.mxu0 %v1159_v10  ;;  %v1173_v20 = vld [vmem:[#allocation2 + $0x44] ss:$16 sps:$4 sm:$0xff]   ;;  %v1177_v22 = vld [vmem:[#allocation2 + $0x40] ss:$16 sps:$4 sm:$0xff]   ;;  %v1251_v10 = vld [vmem:[#allocation2 + $0xcc] ss:$16 sps:$4 sm:$0xff]   ;;  %p1387_p0 = pnand %p1386_p13, %p1380_p10 }
  0x27   :  { %868 = vmatpush1.bf16.msra.mxu1 %v1160_v11  ;;  %828 = vmatprep.subr.bf16.mxu0 %v1161_v12  ;;  %v1175_v21 = vld [vmem:[#allocation2 + $0x244] ss:$16 sps:$4 sm:$0xff]   ;;  %v1178_v23 = vld [vmem:[#allocation2 + $0x240] ss:$16 sps:$4 sm:$0xff]   ;;  %v1254_v11 = vld [vmem:[#allocation2 + $0x2cc] ss:$16 sps:$4 sm:$0xff]  }
  0x28   :  { %869 = vmatprep.subr.bf16.mxu1 %v1163_v13  ;;  %v1179_v24 = vld [vmem:[#allocation2 + $0x24] ss:$16 sps:$4 sm:$0xff]   ;;  %v1183_v26 = vld [vmem:[#allocation2 + $0x20] ss:$16 sps:$4 sm:$0xff]   ;;  %v1249_v12 = vld [vmem:[#allocation2 + $0xc8] ss:$16 sps:$4 sm:$0xff]  }
  0x29   :  { %v1181_v25 = vld [vmem:[#allocation2 + $0x224] ss:$16 sps:$4 sm:$0xff]   ;;  %v1184_v27 = vld [vmem:[#allocation2 + $0x220] ss:$16 sps:$4 sm:$0xff]   ;;  %v1252_v13 = vld [vmem:[#allocation2 + $0x2c8] ss:$16 sps:$4 sm:$0xff]  }
  0x2a   :  { %829 = vmatpush1.bf16.msra.mxu0 %v1165_v14  ;;  %v1185_v28 = vld [vmem:[#allocation2 + $0x4] ss:$16 sps:$4 sm:$0xff]   ;;  %v1189_v30 = vld [vmem:[#allocation2] ss:$16 sps:$4 sm:$0xff]   ;;  %v1257_v14 = vld [vmem:[#allocation2 + $0xac] ss:$16 sps:$4 sm:$0xff]  }
  0x2b   :  { %870 = vmatpush1.bf16.msra.mxu1 %v1166_v15  ;;  %830 = vmatprep.subr.bf16.mxu0 %v1167_v16  ;;  %v1187_v29 = vld [vmem:[#allocation2 + $0x204] ss:$16 sps:$4 sm:$0xff]   ;;  %v1190_v31 = vld [vmem:[#allocation2 + $0x200] ss:$16 sps:$4 sm:$0xff]   ;;  %v1260_v15 = vld [vmem:[#allocation2 + $0x2ac] ss:$16 sps:$4 sm:$0xff]  }
  0x2c   :  { %871 = vmatprep.subr.bf16.mxu1 %v1169_v17  ;;  %v1191_v32 = vld [vmem:[#allocation2 + $0x1e4] ss:$16 sps:$4 sm:$0xff]   ;;  %v1195_v34 = vld [vmem:[#allocation2 + $0x1e0] ss:$16 sps:$4 sm:$0xff]   ;;  %v1255_v16 = vld [vmem:[#allocation2 + $0xa8] ss:$16 sps:$4 sm:$0xff]  }
  0x2d   :  { %v1193_v33 = vld [vmem:[#allocation2 + $0x3e4] ss:$16 sps:$4 sm:$0xff]   ;;  %v1196_v35 = vld [vmem:[#allocation2 + $0x3e0] ss:$16 sps:$4 sm:$0xff]   ;;  %v1258_v17 = vld [vmem:[#allocation2 + $0x2a8] ss:$16 sps:$4 sm:$0xff]  }
  0x2e   :  { %831 = vmatpush1.bf16.msra.mxu0 %v1171_v18  ;;  %v1197_v36 = vld [vmem:[#allocation2 + $0x1c4] ss:$16 sps:$4 sm:$0xff]   ;;  %v1201_v38 = vld [vmem:[#allocation2 + $0x1c0] ss:$16 sps:$4 sm:$0xff]   ;;  %v1263_v18 = vld [vmem:[#allocation2 + $0x8c] ss:$16 sps:$4 sm:$0xff]  }
  0x2f   :  { %872 = vmatpush1.bf16.msra.mxu1 %v1172_v19  ;;  %832 = vmatprep.subr.bf16.mxu0 %v1173_v20  ;;  %v1199_v37 = vld [vmem:[#allocation2 + $0x3c4] ss:$16 sps:$4 sm:$0xff]   ;;  %v1202_v39 = vld [vmem:[#allocation2 + $0x3c0] ss:$16 sps:$4 sm:$0xff]   ;;  %v1266_v19 = vld [vmem:[#allocation2 + $0x28c] ss:$16 sps:$4 sm:$0xff]  }
  0x30   :  { %873 = vmatprep.subr.bf16.mxu1 %v1175_v21  ;;  %v1203_v40 = vld [vmem:[#allocation2 + $0x1a4] ss:$16 sps:$4 sm:$0xff]   ;;  %v1207_v42 = vld [vmem:[#allocation2 + $0x1a0] ss:$16 sps:$4 sm:$0xff]   ;;  %v1261_v20 = vld [vmem:[#allocation2 + $0x88] ss:$16 sps:$4 sm:$0xff]  }
  0x31   :  { %v1205_v41 = vld [vmem:[#allocation2 + $0x3a4] ss:$16 sps:$4 sm:$0xff]   ;;  %v1208_v43 = vld [vmem:[#allocation2 + $0x3a0] ss:$16 sps:$4 sm:$0xff]   ;;  %v1264_v21 = vld [vmem:[#allocation2 + $0x288] ss:$16 sps:$4 sm:$0xff]  }
  0x32   :  { %833 = vmatpush1.bf16.msra.mxu0 %v1177_v22  ;;  %v1209_v44 = vld [vmem:[#allocation2 + $0x184] ss:$16 sps:$4 sm:$0xff]   ;;  %v1213_v49 = vld [vmem:[#allocation2 + $0x180] ss:$16 sps:$4 sm:$0xff]   ;;  %v1269_v22 = vld [vmem:[#allocation2 + $0x6c] ss:$16 sps:$4 sm:$0xff]  }
  0x33   :  { %874 = vmatpush1.bf16.msra.mxu1 %v1178_v23  ;;  %834 = vmatprep.subr.bf16.mxu0 %v1179_v24  ;;  %v1211_v45 = vld [vmem:[#allocation2 + $0x384] ss:$16 sps:$4 sm:$0xff]   ;;  %v1214_v50 = vld [vmem:[#allocation2 + $0x380] ss:$16 sps:$4 sm:$0xff]   ;;  %v1272_v23 = vld [vmem:[#allocation2 + $0x26c] ss:$16 sps:$4 sm:$0xff]  }
  0x34   :  { %875 = vmatprep.subr.bf16.mxu1 %v1181_v25  ;;  %v38_v46 = vld [vmem:[#allocation5] sm:$0xff]  ;;  %v1267_v24 = vld [vmem:[#allocation2 + $0x68] ss:$16 sps:$4 sm:$0xff]  }
  0x35   :  { %v1431_v47 = vcombine.high %v38_v46, %v38_v46  ;;  %v1215_v52 = vld [vmem:[#allocation2 + $0x164] ss:$16 sps:$4 sm:$0xff]   ;;  %v1219_v54 = vld [vmem:[#allocation2 + $0x160] ss:$16 sps:$4 sm:$0xff]   ;;  %v1434_v6 = vcombine.low %v38_v46, %v38_v46  ;;  %v1270_v25 = vld [vmem:[#allocation2 + $0x268] ss:$16 sps:$4 sm:$0xff]  }
  0x36   :  { %835 = vmatpush1.bf16.msra.mxu0 %v1183_v26  ;;  %v1217_v53 = vld [vmem:[#allocation2 + $0x364] ss:$16 sps:$4 sm:$0xff]   ;;  %v1220_v55 = vld [vmem:[#allocation2 + $0x360] ss:$16 sps:$4 sm:$0xff]   ;;  %v1275_v26 = vld [vmem:[#allocation2 + $0x4c] ss:$16 sps:$4 sm:$0xff]  }
  0x37   :  { %876 = vmatpush1.bf16.msra.mxu1 %v1184_v27  ;;  %836 = vmatprep.subr.bf16.mxu0 %v1185_v28  ;;  %v1221_v56 = vld [vmem:[#allocation2 + $0x144] ss:$16 sps:$4 sm:$0xff]   ;;  %v1225_v58 = vld [vmem:[#allocation2 + $0x140] ss:$16 sps:$4 sm:$0xff]   ;;  %v1278_v27 = vld [vmem:[#allocation2 + $0x24c] ss:$16 sps:$4 sm:$0xff]  }
  0x38   :  { %877 = vmatprep.subr.bf16.mxu1 %v1187_v29  ;;  %854 = vmatprep.mubr.bf16.mxu0 %v1431_v47  ;;  %v1223_v57 = vld [vmem:[#allocation2 + $0x344] ss:$16 sps:$4 sm:$0xff]   ;;  %v1226_v59 = vld [vmem:[#allocation2 + $0x340] ss:$16 sps:$4 sm:$0xff]   ;;  %v1273_v28 = vld [vmem:[#allocation2 + $0x48] ss:$16 sps:$4 sm:$0xff]  }
  0x39   :  { %v1227_v60 = vld [vmem:[#allocation2 + $0x124] ss:$16 sps:$4 sm:$0xff]   ;;  %v1231_v62 = vld [vmem:[#allocation2 + $0x120] ss:$16 sps:$4 sm:$0xff]   ;;  %v1276_v29 = vld [vmem:[#allocation2 + $0x248] ss:$16 sps:$4 sm:$0xff]  }
  0x3a   :  { %837 = vmatpush1.bf16.msra.mxu0 %v1189_v30  ;;  %v1229_v61 = vld [vmem:[#allocation2 + $0x324] ss:$16 sps:$4 sm:$0xff]   ;;  %v1232_v63 = vld [vmem:[#allocation2 + $0x320] ss:$16 sps:$4 sm:$0xff]   ;;  %v1281_v30 = vld [vmem:[#allocation2 + $0x2c] ss:$16 sps:$4 sm:$0xff]  }
  0x3b   :  { %878 = vmatpush1.bf16.msra.mxu1 %v1190_v31  ;;  %838 = vmatprep.subr.bf16.mxu0 %v1191_v32  ;;  %v1233_v0 = vld [vmem:[#allocation2 + $0x104] ss:$16 sps:$4 sm:$0xff]   ;;  %v1237_v2 = vld [vmem:[#allocation2 + $0x100] ss:$16 sps:$4 sm:$0xff]   ;;  %v1284_v31 = vld [vmem:[#allocation2 + $0x22c] ss:$16 sps:$4 sm:$0xff]  }
  0x3c   :  { %879 = vmatprep.subr.bf16.mxu1 %v1193_v33  ;;  %v1235_v1 = vld [vmem:[#allocation2 + $0x304] ss:$16 sps:$4 sm:$0xff]   ;;  %v1238_v3 = vld [vmem:[#allocation2 + $0x300] ss:$16 sps:$4 sm:$0xff]   ;;  %v1279_v32 = vld [vmem:[#allocation2 + $0x28] ss:$16 sps:$4 sm:$0xff]  }
  0x3d   :  { %v1282_v33 = vld [vmem:[#allocation2 + $0x228] ss:$16 sps:$4 sm:$0xff]   ;;  %v1305_v46 = vld [vmem:[#allocation2 + $0x1ac] ss:$16 sps:$4 sm:$0xff]  }
  0x3e   :  { %839 = vmatpush2.bf16.msra.mxu0 %v1195_v34  ;;  %v1287_v34 = vld [vmem:[#allocation2 + $0xc] ss:$16 sps:$4 sm:$0xff]  }
  0x3f   :  { %880 = vmatpush2.bf16.msra.mxu1 %v1196_v35  ;;  %840 = vmatprep.subr.bf16.mxu0 %v1197_v36  ;;  %v1290_v35 = vld [vmem:[#allocation2 + $0x20c] ss:$16 sps:$4 sm:$0xff]   ;;  %v1285_v36 = vld [vmem:[#allocation2 + $0x8] ss:$16 sps:$4 sm:$0xff]  }
  0x40   :  { %881 = vmatprep.subr.bf16.mxu1 %v1199_v37  ;;  %v1288_v37 = vld [vmem:[#allocation2 + $0x208] ss:$16 sps:$4 sm:$0xff]  }
  0x42   :  { %841 = vmatpush2.bf16.msra.mxu0 %v1201_v38  ;;  %v1293_v38 = vld [vmem:[#allocation2 + $0x1ec] ss:$16 sps:$4 sm:$0xff]  }
  0x43   :  { %882 = vmatpush2.bf16.msra.mxu1 %v1202_v39  ;;  %842 = vmatprep.subr.bf16.mxu0 %v1203_v40  ;;  %v1296_v39 = vld [vmem:[#allocation2 + $0x3ec] ss:$16 sps:$4 sm:$0xff]   ;;  %v1291_v40 = vld [vmem:[#allocation2 + $0x1e8] ss:$16 sps:$4 sm:$0xff]  }
  0x44   :  { %883 = vmatprep.subr.bf16.mxu1 %v1205_v41  ;;  %v1294_v41 = vld [vmem:[#allocation2 + $0x3e8] ss:$16 sps:$4 sm:$0xff]  }
  0x46   :  { %843 = vmatpush2.bf16.msra.mxu0 %v1207_v42  ;;  %v1299_v42 = vld [vmem:[#allocation2 + $0x1cc] ss:$16 sps:$4 sm:$0xff]  }
  0x47   :  { %884 = vmatpush2.bf16.msra.mxu1 %v1208_v43  ;;  %844 = vmatprep.subr.bf16.mxu0 %v1209_v44  ;;  %v1302_v43 = vld [vmem:[#allocation2 + $0x3cc] ss:$16 sps:$4 sm:$0xff]   ;;  %v1297_v44 = vld [vmem:[#allocation2 + $0x1c8] ss:$16 sps:$4 sm:$0xff]  }
  0x48   :  { %885 = vmatprep.subr.bf16.mxu1 %v1211_v45  ;;  %v1300_v45 = vld [vmem:[#allocation2 + $0x3c8] ss:$16 sps:$4 sm:$0xff]  }
  0x4a   :  { %845 = vmatpush2.bf16.msra.mxu0 %v1213_v49  ;;  %v1306_v49 = vld [vmem:[#allocation2 + $0x3a8] ss:$16 sps:$4 sm:$0xff]  }
  0x4b   :  { %886 = vmatpush2.bf16.msra.mxu1 %v1214_v50  ;;  %846 = vmatprep.subr.bf16.mxu0 %v1215_v52  ;;  %v1311_v50 = vld [vmem:[#allocation2 + $0x18c] ss:$16 sps:$4 sm:$0xff]   ;;  %v1309_v52 = vld [vmem:[#allocation2 + $0x188] ss:$16 sps:$4 sm:$0xff]  }
  0x4c   :  { %887 = vmatprep.subr.bf16.mxu1 %v1217_v53  ;;  %v1312_v53 = vld [vmem:[#allocation2 + $0x388] ss:$16 sps:$4 sm:$0xff]  }
  0x4e   :  { %847 = vmatpush2.bf16.msra.mxu0 %v1219_v54  ;;  %v1317_v54 = vld [vmem:[#allocation2 + $0x16c] ss:$16 sps:$4 sm:$0xff]  }
  0x4f   :  { %888 = vmatpush2.bf16.msra.mxu1 %v1220_v55  ;;  %848 = vmatprep.subr.bf16.mxu0 %v1221_v56  ;;  %v1320_v55 = vld [vmem:[#allocation2 + $0x36c] ss:$16 sps:$4 sm:$0xff]   ;;  %v1315_v56 = vld [vmem:[#allocation2 + $0x168] ss:$16 sps:$4 sm:$0xff]  }
  0x50   :  { %889 = vmatprep.subr.bf16.mxu1 %v1223_v57  ;;  %v1318_v57 = vld [vmem:[#allocation2 + $0x368] ss:$16 sps:$4 sm:$0xff]  }
  0x52   :  { %849 = vmatpush2.bf16.msra.mxu0 %v1225_v58  ;;  %v1323_v58 = vld [vmem:[#allocation2 + $0x14c] ss:$16 sps:$4 sm:$0xff]  }
  0x53   :  { %890 = vmatpush2.bf16.msra.mxu1 %v1226_v59  ;;  %850 = vmatprep.subr.bf16.mxu0 %v1227_v60  ;;  %v1326_v59 = vld [vmem:[#allocation2 + $0x34c] ss:$16 sps:$4 sm:$0xff]   ;;  %v1321_v60 = vld [vmem:[#allocation2 + $0x148] ss:$16 sps:$4 sm:$0xff]  }
  0x54   :  { %891 = vmatprep.subr.bf16.mxu1 %v1229_v61  ;;  %v1324_v61 = vld [vmem:[#allocation2 + $0x348] ss:$16 sps:$4 sm:$0xff]  }
  0x56   :  { %851 = vmatpush2.bf16.msra.mxu0 %v1231_v62  ;;  %v1329_v62 = vld [vmem:[#allocation2 + $0x12c] ss:$16 sps:$4 sm:$0xff]  }
  0x57   :  { %892 = vmatpush2.bf16.msra.mxu1 %v1232_v63  ;;  %852 = vmatprep.subr.bf16.mxu0 %v1233_v0  ;;  %v1332_v63 = vld [vmem:[#allocation2 + $0x32c] ss:$16 sps:$4 sm:$0xff]   ;;  %v1327_v0 = vld [vmem:[#allocation2 + $0x128] ss:$16 sps:$4 sm:$0xff]  }
  0x58   :  { %893 = vmatprep.subr.bf16.mxu1 %v1235_v1  ;;  %v1330_v1 = vld [vmem:[#allocation2 + $0x328] ss:$16 sps:$4 sm:$0xff]  }
  0x5a   :  { %853 = vmatpush2.bf16.msra.mxu0 %v1237_v2  ;;  %v1335_v2 = vld [vmem:[#allocation2 + $0x10c] ss:$16 sps:$4 sm:$0xff]  }
  0x5b   :  { %894 = vmatpush2.bf16.msra.mxu1 %v1238_v3  ;;  %904 = vmatprep.subr.bf16.mxu0 %v1245_v4  ;;  %v1338_v3 = vld [vmem:[#allocation2 + $0x30c] ss:$16 sps:$4 sm:$0xff]   ;;  %v1333_v4 = vld [vmem:[#allocation2 + $0x108] ss:$16 sps:$4 sm:$0xff]  }
  0x5c   :  { %945 = vmatprep.subr.bf16.mxu1 %v1248_v5  ;;  %v1336_v5 = vld [vmem:[#allocation2 + $0x308] ss:$16 sps:$4 sm:$0xff]  }
  0x5d   :  { %855 = vmatmul.mubr.bf16.vlgmr.msra.gmra.mxu0 %v1434_v6 }
  0x5e   :  { %896 = vmatmul.mubr.bf16.vlgmr.msra.gmra.mxu1 %v1436_v7  ;;  %905 = vmatpush1.bf16.msra.mxu0 %v1243_v8 }
  0x5f   :  { %946 = vmatpush1.bf16.msra.mxu1 %v1246_v9  ;;  %906 = vmatprep.subr.bf16.mxu0 %v1251_v10 }
  0x60   :  { %947 = vmatprep.subr.bf16.mxu1 %v1254_v11  ;;  %936 = vmatprep.mubr.bf16.mxu0 %v1431_v47  ;;  %v1308_v47 = vld [vmem:[#allocation2 + $0x3ac] ss:$16 sps:$4 sm:$0xff]  }
  0x61   :  { %977 = vmatprep.mubr.bf16.mxu1 %v1009_v51  ;;  %v1314_v51 = vld [vmem:[#allocation2 + $0x38c] ss:$16 sps:$4 sm:$0xff]  }
  0x62   :  { %907 = vmatpush1.bf16.msra.mxu0 %v1249_v12 }
  0x63   :  { %948 = vmatpush1.bf16.msra.mxu1 %v1252_v13  ;;  %908 = vmatprep.subr.bf16.mxu0 %v1257_v14 }
  0x64   :  { %949 = vmatprep.subr.bf16.mxu1 %v1260_v15 }
  0x66   :  { %909 = vmatpush1.bf16.msra.mxu0 %v1255_v16 }
  0x67   :  { %950 = vmatpush1.bf16.msra.mxu1 %v1258_v17  ;;  %910 = vmatprep.subr.bf16.mxu0 %v1263_v18 }
  0x68   :  { %951 = vmatprep.subr.bf16.mxu1 %v1266_v19 }
  0x6a   :  { %911 = vmatpush1.bf16.msra.mxu0 %v1261_v20 }
  0x6b   :  { %952 = vmatpush1.bf16.msra.mxu1 %v1264_v21  ;;  %912 = vmatprep.subr.bf16.mxu0 %v1269_v22 }
  0x6c   :  { %953 = vmatprep.subr.bf16.mxu1 %v1272_v23 }
  0x6e   :  { %913 = vmatpush1.bf16.msra.mxu0 %v1267_v24 }
  0x6f   :  { %954 = vmatpush1.bf16.msra.mxu1 %v1270_v25  ;;  %914 = vmatprep.subr.bf16.mxu0 %v1275_v26 }
  0x70   :  { %955 = vmatprep.subr.bf16.mxu1 %v1278_v27 }
  0x72   :  { %915 = vmatpush1.bf16.msra.mxu0 %v1273_v28 }
  0x73   :  { %956 = vmatpush1.bf16.msra.mxu1 %v1276_v29  ;;  %916 = vmatprep.subr.bf16.mxu0 %v1281_v30 }
  0x74   :  { %957 = vmatprep.subr.bf16.mxu1 %v1284_v31 }
  0x76   :  { %917 = vmatpush1.bf16.msra.mxu0 %v1279_v32 }
  0x77   :  { %958 = vmatpush1.bf16.msra.mxu1 %v1282_v33  ;;  %918 = vmatprep.subr.bf16.mxu0 %v1287_v34 }
  0x78   :  { %959 = vmatprep.subr.bf16.mxu1 %v1290_v35 }
  0x7a   :  { %919 = vmatpush1.bf16.msra.mxu0 %v1285_v36 }
  0x7b   :  { %960 = vmatpush1.bf16.msra.mxu1 %v1288_v37  ;;  %920 = vmatprep.subr.bf16.mxu0 %v1293_v38 }
  0x7c   :  { %961 = vmatprep.subr.bf16.mxu1 %v1296_v39 }
  0x7e   :  { %921 = vmatpush2.bf16.msra.mxu0 %v1291_v40 }
  0x7f   :  { %962 = vmatpush2.bf16.msra.mxu1 %v1294_v41  ;;  %922 = vmatprep.subr.bf16.mxu0 %v1299_v42 }
  0x80   :  { %963 = vmatprep.subr.bf16.mxu1 %v1302_v43 }
  0x82   :  { %923 = vmatpush2.bf16.msra.mxu0 %v1297_v44 }
  0x83   :  { %964 = vmatpush2.bf16.msra.mxu1 %v1300_v45  ;;  %924 = vmatprep.subr.bf16.mxu0 %v1305_v46 }
  0x84   :  { %965 = vmatprep.subr.bf16.mxu1 %v1308_v47 }
  0x86   :  { %925 = vmatpush2.bf16.msra.mxu0 %v1303_v48 }
  0x87   :  { %966 = vmatpush2.bf16.msra.mxu1 %v1306_v49  ;;  %926 = vmatprep.subr.bf16.mxu0 %v1311_v50 }
  0x88   :  { %967 = vmatprep.subr.bf16.mxu1 %v1314_v51 }
  0x8a   :  { %927 = vmatpush2.bf16.msra.mxu0 %v1309_v52 }
  0x8b   :  { %968 = vmatpush2.bf16.msra.mxu1 %v1312_v53  ;;  %928 = vmatprep.subr.bf16.mxu0 %v1317_v54 }
  0x8c   :  { %969 = vmatprep.subr.bf16.mxu1 %v1320_v55 }
  0x8e   :  { %929 = vmatpush2.bf16.msra.mxu0 %v1315_v56 }
  0x8f   :  { %970 = vmatpush2.bf16.msra.mxu1 %v1318_v57  ;;  %930 = vmatprep.subr.bf16.mxu0 %v1323_v58 }
  0x90   :  { %971 = vmatprep.subr.bf16.mxu1 %v1326_v59 }
  0x92   :  { %931 = vmatpush2.bf16.msra.mxu0 %v1321_v60 }
  0x93   :  { %972 = vmatpush2.bf16.msra.mxu1 %v1324_v61  ;;  %932 = vmatprep.subr.bf16.mxu0 %v1329_v62 }
  0x94   :  { %973 = vmatprep.subr.bf16.mxu1 %v1332_v63 }
  0x96   :  { %933 = vmatpush2.bf16.msra.mxu0 %v1327_v0 }
  0x97   :  { %974 = vmatpush2.bf16.msra.mxu1 %v1330_v1  ;;  %934 = vmatprep.subr.bf16.mxu0 %v1335_v2 }
  0x98   :  { %975 = vmatprep.subr.bf16.mxu1 %v1338_v3 }
  0x9a   :  { %935 = vmatpush2.bf16.msra.mxu0 %v1333_v4 }
  0x9b   :  { %976 = vmatpush2.bf16.msra.mxu1 %v1336_v5 }
  0x9d   :  { %937 = vmatmul.mubr.bf16.vlgmr.msra.gmra.mxu0 %v1434_v6 }
  0x9e   :  { %978 = vmatmul.mubr.bf16.vlgmr.msra.gmra.mxu1 %v1436_v7 }
 0x11d   :  { %v856_v8 = vpop.f32.mrf.mxu0 }
 0x11e   :  { %v897_v9 = vpop.f32.mrf.mxu1 }
 0x11f   :  { %v898_v10 = vadd.f32 %v897_v9, %v856_v8  ;;  %v858_v11 = vpop.f32.mrf.mxu0 }
 0x120   :  { %v899_v12 = vpop.f32.mrf.mxu1 }
 0x121   :  { %986 = vst [vmem:[#allocation7] sm:$0xff] %v898_v10  ;;  %v900_v13 = vadd.f32 %v899_v12, %v858_v11  ;;  %v860_v14 = vpop.f32.mrf.mxu0 }
 0x122   :  { %v901_v15 = vpop.f32.mrf.mxu1 }
 0x123   :  { %987 = vst [vmem:[#allocation7 + $0x8] sm:$0xff] %v900_v13  ;;  %v861_v16 = vpop.f32.mrf.mxu0 }
 0x124   :  { %v902_v17 = vpop.f32.mrf.mxu1 }
 0x15d   :  { %v938_v18 = vpop.f32.mrf.mxu0 }
 0x15e   :  { %v979_v19 = vpop.f32.mrf.mxu1 }
 0x15f   :  { %v980_v20 = vadd.f32 %v979_v19, %v938_v18  ;;  %v940_v6 = vpop.f32.mrf.mxu0 }
 0x160   :  { %v981_v21 = vpop.f32.mrf.mxu1 }
 0x161   :  { %988 = vst [vmem:[#allocation7 + $0x10] sm:$0xff] %v980_v20  ;;  %v982_v7 = vadd.f32 %v981_v21, %v940_v6  ;;  %v942_v22 = vpop.f32.mrf.mxu0 }
 0x162   :  { %v983_v23 = vpop.f32.mrf.mxu1 }
 0x163   :  { %989 = vst [vmem:[#allocation7 + $0x18] sm:$0xff] %v982_v7  ;;  %v943_v24 = vpop.f32.mrf.mxu0 }
 0x164   :  { %v984_v25 = vpop.f32.mrf.mxu1 }
 0x165   :  { %1390 = shalt.err (!%p1387_p0)
}
 0x166   :  { %999 = dma.vmem_to_hbm [thread:$0]  %s997_s1, 512, %s1448_s2, [#allocation4]  }
 0x167   :  { %1403 = dma.done.wait [#allocation4], 512  }
 0x168   :  { %1404 = vsyncadd [#allocation4], 4294966784 }
 0x169   :  { %1003 = vsyncpa [#allocation3], 1 }
 0x16a   :  { %1004 = vsyncpa [#allocation6], 1 }
 0x16b   :  { %1005 = vsyncpa [#allocation4], 1 }

</bundles_post_ra>
